<compile_context>
chip_gen: v5e
topology: v5e:2x2
jax: 0.10.0
libtpu: 0.0.40
codegen_flags: <defaults>
</compile_context>

<pallas_src>
import functools

import jax
import jax.numpy as jnp
from jax import lax
from jax.experimental import pallas as pl
from jax.experimental.pallas import tpu as pltpu


def _cdiv(a, b):
    return -(-a // b)


def _round_up(x, m):
    return _cdiv(x, m) * m


def _vmem_capacity_bytes():
    try:
        cap = pltpu.get_tpu_info().vmem_capacity_bytes
        return cap if cap else (128 << 20)
    except Exception:
        return 128 << 20


def _vmem_need(tile_b, tile_h, D, in_bytes):
    """VMEM footprint estimate using the real (lane/sublane padded) layout."""
    d_lane = _round_up(D, 128)   # x last dim padded to lanes in VMEM
    d_sub = _round_up(D, 8)      # W second-to-last dim padded to sublanes
    need = (2 * tile_b * d_lane * in_bytes     # x tiles (double buffered)
            + 2 * tile_b * tile_h * in_bytes   # target tiles
            + 2 * tile_b * tile_h * in_bytes   # pred tiles
            + 2 * d_sub * tile_h * in_bytes    # W column tile (double buffered)
            + 2 * 8 * tile_h * in_bytes        # bias (sublane padded)
            + 2 * 8 * tile_h * 4)              # per-tile SSE partials (f32)
    return need + (2 << 20)                    # compiler-internal scratch allowance


def _choose_tiles(B, D, H_pad, in_bytes):
    """Pick (tile_b, tile_h, H_pad, vmem_limit) with generation-aware budgets."""
    vmem_cap = _vmem_capacity_bytes()
    if vmem_cap >= (100 << 20):
        # v5e / v6e: 128 MiB VMEM, single TensorCore.
        budget, vmem_limit, tile_b_cap = 40 << 20, 64 << 20, 1024
    else:
        # v7x: 64 MiB VMEM per TensorCore, two TensorCores.
        budget, vmem_limit, tile_b_cap = 24 << 20, 36 << 20, 512

    # --- H (lane) tiling: keep the W column tile well inside the budget. ---
    d_sub = _round_up(D, 8)
    w_tile_budget = max(budget // 3, 1 << 20)
    num_h = max(1, _cdiv(2 * d_sub * H_pad * in_bytes, w_tile_budget))
    tile_h = _round_up(_cdiv(H_pad, num_h), 128)
    H_pad = _round_up(H_pad, tile_h)
    num_h = H_pad // tile_h

    # --- Batch tiling: tile-fit so B_pad - B stays small. ---
    tile_b = min(tile_b_cap, _round_up(B, 8))
    n_b = _cdiv(B, tile_b)
    tile_b = _round_up(_cdiv(B, n_b), 8)

    # Guarantee >= 2 total grid steps when the batch is big enough so the
    # parallel grid can shard across v7x's two TensorCores.
    if num_h * n_b < 2 and B >= 16:
        tile_b = _round_up(_cdiv(B, 2), 8)
        n_b = _cdiv(B, tile_b)

    # Apply the VMEM budget (re-fitting the batch each time we shrink).
    while tile_b > 8 and _vmem_need(tile_b, tile_h, D, in_bytes) > budget:
        half = max(8, _round_up(tile_b // 2, 8))
        n_b = _cdiv(B, half)
        tile_b = _round_up(_cdiv(B, n_b), 8)

    return tile_b, tile_h, H_pad, vmem_limit


def _erm_kernel(x_ref, w_ref, bias_ref, t_ref, pred_ref, sse_ref, *,
                rows_valid, tile_b, num_b, ragged):
    b_idx = pl.program_id(1)

    # model(inp): pred = x @ W_tile + bias_tile  (MXU matmul, f32 accumulation)
    pred_f32 = jnp.dot(x_ref[...], w_ref[...],
                       preferred_element_type=jnp.float32)
    pred_f32 = pred_f32 + bias_ref[...].astype(jnp.float32)
    pred = pred_f32.astype(pred_ref.dtype)
    pred_ref[...] = pred                       # lane-dense (tile_b, tile_h) store

    # error_cost(pred, target): squared error of the *stored* (possibly
    # downcast) prediction.
    diff = pred.astype(jnp.float32) - t_ref[...].astype(jnp.float32)
    sq = diff * diff

    def _reduce(v):
        # (tile_b, tile_h) -> (8, tile_h) per-lane partials: pure VPU adds,
        # cross-lane reduction deferred to the wrapper.
        return v.reshape(tile_b // 8, 8, v.shape[-1]).sum(axis=0)[None]

    if ragged:
        # Padded batch rows exist only in the last batch tile; mask them
        # there and keep the steady-state step mask-free.
        @pl.when(b_idx == num_b - 1)
        def _():
            row = b_idx * tile_b + lax.broadcasted_iota(jnp.int32, sq.shape, 0)
            sse_ref[...] = _reduce(jnp.where(row < rows_valid, sq, 0.0))

        @pl.when(b_idx != num_b - 1)
        def _():
            sse_ref[...] = _reduce(sq)
    else:
        sse_ref[...] = _reduce(sq)


def erm_forward(x, w, b, target):
    """Returns (pred, error) exactly like ERM.forward with a linear model."""
    # PyTorch glue: squeeze a leading singleton "env batch" dim if present.
    if x.ndim == 3 and x.shape[0] == 1:
        x = jnp.squeeze(x, 0)
        target = jnp.squeeze(target, 0)

    B, D = x.shape
    H = w.shape[1]
    in_bytes = jnp.dtype(x.dtype).itemsize

    tile_b, tile_h, H_pad, vmem_limit = _choose_tiles(
        B, D, _round_up(H, 128), in_bytes)
    num_h = H_pad // tile_h
    num_b = _cdiv(B, tile_b)
    B_pad = num_b * tile_b
    pad_b, pad_h = B_pad - B, H_pad - H
    ragged = pad_b != 0

    # No-pad fast path: only emit wrapper-side pad passes when genuinely
    # ragged (pads are zero, so pad columns contribute 0 to the SSE).
    x_p = x if pad_b == 0 else jnp.pad(x, ((0, pad_b), (0, 0)))
    t_p = (target if (pad_b == 0 and pad_h == 0)
           else jnp.pad(target, ((0, pad_b), (0, pad_h))))
    w_p = w if pad_h == 0 else jnp.pad(w, ((0, 0), (0, pad_h)))
    b_row = jnp.reshape(b, (1, H))
    b_p = b_row if pad_h == 0 else jnp.pad(b_row, ((0, 0), (0, pad_h)))

    kernel = functools.partial(_erm_kernel, rows_valid=B, tile_b=tile_b,
                               num_b=num_b, ragged=ragged)

    flops = 2 * B_pad * D * H_pad + 4 * B_pad * H_pad
    bytes_accessed = (num_h * B_pad * D * in_bytes        # x re-streamed per h tile
                      + D * H_pad * in_bytes              # W (each column tile once)
                      + H_pad * in_bytes                  # bias
                      + B_pad * H_pad * in_bytes          # target
                      + B_pad * H_pad * in_bytes          # pred out
                      + num_b * 8 * H_pad * 4)            # SSE partials

    pred_p, sse = pl.pallas_call(
        kernel,
        out_shape=(
            jax.ShapeDtypeStruct((B_pad, H_pad), x.dtype),             # pred
            jax.ShapeDtypeStruct((num_b, 8, H_pad), jnp.float32),      # partial SSE
        ),
        grid_spec=pltpu.PrefetchScalarGridSpec(
            num_scalar_prefetch=0,
            grid=(num_h, num_b),          # batch innermost: W tile DMA'd once per h
            in_specs=[
                pl.BlockSpec((tile_b, D), lambda h, bi: (bi, 0)),       # x tile
                pl.BlockSpec((D, tile_h), lambda h, bi: (0, h)),        # W column tile
                pl.BlockSpec((1, tile_h), lambda h, bi: (0, h)),        # bias tile
                pl.BlockSpec((tile_b, tile_h), lambda h, bi: (bi, h)),  # target tile
            ],
            out_specs=(
                pl.BlockSpec((tile_b, tile_h), lambda h, bi: (bi, h)),  # pred tile
                pl.BlockSpec((1, 8, tile_h), lambda h, bi: (bi, 0, h)),  # SSE partial
            ),
        ),
        compiler_params=pltpu.CompilerParams(
            dimension_semantics=("parallel", "parallel"),  # no cross-step state
            vmem_limit_bytes=vmem_limit,
        ),
        cost_estimate=pl.CostEstimate(flops=flops, transcendentals=0,
                                      bytes_accessed=bytes_accessed),
    )(x_p, w_p, b_p, t_p)

    # No-slice fast path when nothing was padded.
    if pad_b == 0 and pad_h == 0:
        pred = pred_p
    elif pad_h == 0:
        pred = pred_p[:B]
    elif pad_b == 0:
        pred = pred_p[:, :H]
    else:
        pred = pred_p[:B, :H]

    err = sse.sum() * (1.0 / float(B * H))   # MSELoss reduction='mean'
    return pred, err


if __name__ == "__main__":
    key = jax.random.PRNGKey(0)
    k_x, k_w, k_b, k_t = jax.random.split(key, 4)

    B, D, H = 16, 32, 16   # small shapes consistent with the module
    x = jax.random.normal(k_x, (B, D), dtype=jnp.float32)
    w = jax.random.normal(k_w, (D, H), dtype=jnp.float32) * 0.1
    b = jax.random.normal(k_b, (1, H), dtype=jnp.float32) * 0.1
    target = jax.random.normal(k_t, (B, H), dtype=jnp.float32)

    pred, err = erm_forward(x, w, b, target)
    jax.block_until_ready((pred, err))

    # Pure-JAX reference (same semantics as ERM.forward with MSELoss).
    pred_ref = x @ w + b
    err_ref = jnp.mean((pred_ref - target) ** 2)
    assert pred.shape == pred_ref.shape, "pred shape mismatch"
    assert jnp.allclose(pred, pred_ref, atol=1e-5), "pred mismatch"
    assert jnp.allclose(err, err_ref, atol=1e-5), "error mismatch"

    print("KERNEL_OK")
</pallas_src>

<mosaic_0001>
module attributes {stable_mosaic.version = 11 : i64} {
  func.func @_erm_kernel(%arg0: i32, %arg1: i32, %arg2: memref<8x32xf32, #tpu.memory_space<vmem>>, %arg3: memref<32x128xf32, #tpu.memory_space<vmem>>, %arg4: memref<1x128xf32, #tpu.memory_space<vmem>>, %arg5: memref<8x128xf32, #tpu.memory_space<vmem>>, %arg6: memref<8x128xf32, #tpu.memory_space<vmem>>, %arg7: memref<1x8x128xf32, #tpu.memory_space<vmem>>) attributes {dimension_semantics = [#tpu.dimension_semantics<parallel>, #tpu.dimension_semantics<parallel>], iteration_bounds = array<i64: 1, 2>, scalar_prefetch = 0 : i64, scratch_operands = 0 : i64, tpu.core_type = #tpu.core_type<tc>, window_params = [{transform_indices = @transform_0, window_bounds = array<i64: 8, 32>}, {transform_indices = @transform_1, window_bounds = array<i64: 32, 128>}, {transform_indices = @transform_2, window_bounds = array<i64: 1, 128>}, {transform_indices = @transform_3, window_bounds = array<i64: 8, 128>}, {transform_indices = @transform_4, window_bounds = array<i64: 8, 128>}, {transform_indices = @transform_5, window_bounds = array<i64: 1, 8, 128>}]} {
    %c0 = arith.constant 0 : index
    %c0_0 = arith.constant 0 : index
    %0 = vector.load %arg2[%c0, %c0_0] : memref<8x32xf32, #tpu.memory_space<vmem>>, vector<8x32xf32>
    %c0_1 = arith.constant 0 : index
    %c0_2 = arith.constant 0 : index
    %1 = vector.load %arg3[%c0_1, %c0_2] : memref<32x128xf32, #tpu.memory_space<vmem>>, vector<32x128xf32>
    %cst = arith.constant dense<0.000000e+00> : vector<8x128xf32>
    %2 = tpu.matmul %0, %1, %cst {dimension_numbers = #tpu.dot_dimension_numbers<[1], [0], [0], [1], [0, 0, 1, 1], [], []>} : vector<8x32xf32>, vector<32x128xf32>, vector<8x128xf32> -> vector<8x128xf32>
    %c0_3 = arith.constant 0 : index
    %c0_4 = arith.constant 0 : index
    %3 = vector.load %arg4[%c0_3, %c0_4] : memref<1x128xf32, #tpu.memory_space<vmem>>, vector<1x128xf32>
    %4 = vector.broadcast %3 : vector<1x128xf32> to vector<8x128xf32>
    %5 = arith.addf %2, %4 : vector<8x128xf32>
    %c0_5 = arith.constant 0 : index
    %c0_6 = arith.constant 0 : index
    %6 = vector.load %arg6[%c0_5, %c0_6] : memref<8x128xf32, #tpu.memory_space<vmem>>, vector<8x128xf32>
    tpu.vector_store %arg6[%c0_5, %c0_6], %5 {strides = array<i32>} : memref<8x128xf32, #tpu.memory_space<vmem>>, vector<8x128xf32>,
    %c0_7 = arith.constant 0 : index
    %c0_8 = arith.constant 0 : index
    %7 = vector.load %arg5[%c0_7, %c0_8] : memref<8x128xf32, #tpu.memory_space<vmem>>, vector<8x128xf32>
    %8 = arith.subf %5, %7 : vector<8x128xf32>
    %9 = arith.mulf %8, %8 : vector<8x128xf32>
    %10 = vector.shape_cast %9 : vector<8x128xf32> to vector<1x8x128xf32>
    %cst_9 = arith.constant dense<0.000000e+00> : vector<8x128xf32>
    %11 = vector.multi_reduction <add>, %10, %cst_9 [0] : vector<1x8x128xf32> to vector<8x128xf32>
    %12 = vector.shape_cast %11 : vector<8x128xf32> to vector<1x8x128xf32>
    %c0_10 = arith.constant 0 : index
    %c0_11 = arith.constant 0 : index
    %c0_12 = arith.constant 0 : index
    %13 = vector.load %arg7[%c0_10, %c0_11, %c0_12] : memref<1x8x128xf32, #tpu.memory_space<vmem>>, vector<1x8x128xf32>
    tpu.vector_store %arg7[%c0_10, %c0_11, %c0_12], %12 {strides = array<i32>} : memref<1x8x128xf32, #tpu.memory_space<vmem>>, vector<1x8x128xf32>,
    return
  }
  func.func @transform_0(%arg0: i32, %arg1: i32) -> (i32, i32) {
    %c0_i32 = arith.constant 0 : i32
    %c0_i32_0 = arith.constant 0 : i32
    return %arg1, %c0_i32 : i32, i32
  }
  func.func @transform_1(%arg0: i32, %arg1: i32) -> (i32, i32) {
    %c0_i32 = arith.constant 0 : i32
    %c0_i32_0 = arith.constant 0 : i32
    return %c0_i32, %arg0 : i32, i32
  }
  func.func @transform_2(%arg0: i32, %arg1: i32) -> (i32, i32) {
    %c0_i32 = arith.constant 0 : i32
    %c0_i32_0 = arith.constant 0 : i32
    return %c0_i32, %arg0 : i32, i32
  }
  func.func @transform_3(%arg0: i32, %arg1: i32) -> (i32, i32) {
    %c0_i32 = arith.constant 0 : i32
    return %arg1, %arg0 : i32, i32
  }
  func.func @transform_4(%arg0: i32, %arg1: i32) -> (i32, i32) {
    %c0_i32 = arith.constant 0 : i32
    return %arg1, %arg0 : i32, i32
  }
  func.func @transform_5(%arg0: i32, %arg1: i32) -> (i32, i32, i32) {
    %c0_i32 = arith.constant 0 : i32
    %c0_i32_0 = arith.constant 0 : i32
    return %arg1, %c0_i32, %arg0 : i32, i32, i32
  }
}

</mosaic_0001>

<bundles_post_ra>
// kernel: tpu_custom_call.1
= control target key start
LH: loop header
LB: loop body
LE: loop exit
PB: predicated region body
PF: predicated region fallthrough
CT: control target
= control target key end

     0   :  { %11 = vsyncpa [#allocation3], 0  ;;  %s1127_s0 = inlined_call_operand.hbm [shape: f32[16,32], index: 0, kind: input, shape index: {}]   ;;  %s1128_s1 = inlined_call_operand.hbm [shape: f32[32,128], index: 1, kind: input, shape index: {}]   ;;  %s1129_s2 = inlined_call_operand.vmem [shape: f32[1,128], index: 2, kind: input, shape index: {}]   ;;  %s1130_s3 = inlined_call_operand.hbm [shape: f32[16,128], index: 3, kind: input, shape index: {}]   ;;  %s1131_s4 = inlined_call_operand.hbm [shape: f32[16,128], index: 4, kind: output, shape index: {0}]   ;;  %s1132_s5 = inlined_call_operand.hbm [shape: f32[2,8,128], index: 5, kind: output, shape index: {1}]  }
   0x1   :  { %13 = vsyncpa [#allocation3 + $0x1], 0 }
   0x2   :  { %14 = vsyncpa [#allocation6], 0 }
   0x3   :  { %15 = vsyncpa [#allocation4], 0 }
   0x4   :  { %17 = vsyncpa [#allocation4 + $0x1], 0 }
   0x5   :  { %18 = vsyncpa [#allocation10], 0 }
   0x6   :  { %20 = vsyncpa [#allocation10 + $0x1], 0  ;;  %s936_s18 = smov 0   ;;  %s938_s19 = smov 0  }
   0x7   :  { %s940_s20 = smov 0   ;;  %s942_s21 = smov 0  }
   0x8   :  { %s944_s22 = smov 0   ;;  %s946_s23 = smov 0  }
   0x9 LB: > { %s967_s24 = sadd.s32 4294967295, %s901_s23   ;;  %s581_s25 = sadd.s32 4294967294, %s901_s23   ;;  %s901_s23 = sphi %s946_s23, %s26_s23   ;;  %s897_s22 = sphi %s944_s22, %s1146_s22   ;;  %s893_s21 = sphi %s942_s21, %s1145_s21   ;;  %s889_s20 = sphi %s940_s20, %s1144_s20   ;;  %s885_s19 = sphi %s938_s19, %s1143_s19   ;;  %s881_s18 = sphi %s936_s18, %s1142_s18  }
   0xa   : > { %s35_s26 = sadd.s32 1, %s897_s22  ;;  %s45_s27 = sadd.s32 1, %s889_s20 }
   0xb   : > { %p36_p0 = scmp.ge.s32.totalorder %s35_s26, 2  ;;  %p52_p1 = scmp.ne.s32.totalorder %s889_s20, %s885_s19 }
   0xc   : > { %p53_p2 = scmp.eq.s32.totalorder %s901_s23, 0  ;;  %p58_p3 = scmp.ne.s32.totalorder %s885_s19, %s881_s18 }
   0xd   : > { %s1148_s26 = smov (%p36_p0, %s35_s26), 0  ;;  %p164_p5 = scmp.eq.s32.totalorder %s967_s24, 1 }
   0xe   : > { %1134 = sst [smem:[#allocation16_spill]] %s1148_s26  ;;  %p979_p4 = por %p53_p2, %p52_p1 }
   0xf   : > { %s42_s29 = ssub.s32 %s897_s22, %s1148_s26  ;;  %p170_p6 = scmp.eq.s32.totalorder %s581_s25, 1 }
  0x10   : > { %p43_p7 = scmp.eq.s32.totalorder %s42_s29, 0  ;;  %p986_p8 = por %p164_p5, %p52_p1 }
  0x11   : > { %p993_p9 = por %p170_p6, %p58_p3  ;;  %p585_p10 = scmp.ge.s32.totalorder %s901_s23, 2 }
  0x12   : > { %s998_s7 = scalar_select %p43_p7, %s889_s20, %s45_s27  }
  0x13   : > { %p634_p11 = scmp.lt.s32.totalorder %s901_s23, 2  ;;  %s240_s8 = sand.u32 1, %s901_s23  }
  0x14   : > { %s242_s9 = sand.u32 1, %s889_s20   ;;  %s587_s11 = sshll.u32 %s897_s22, 3 }
  0x15   : > { %s586_s10 = sshll.u32 %s242_s9, 3  ;;  %s248_s14 = scalar_lea.hbm %s1127_s0, %s587_s11 }
  0x16   : > { %s244_s15 = scalar_lea.vmem [#allocation2], %s586_s10  ;;  %s250_s17 = sshll.u32 %s248_s14, 4  ;;  %s251_s17 = int_to_ptr.hbm [resolvable:$true] %s250_s17 }
  0x17   : > { %s252_s16 = sshll.u32 %s244_s15, 4  ;;  %p1010_p12 = pnand %p634_p11, %p979_p4  ;;  %s253_s16 = int_to_ptr.vmem [resolvable:$true] %s252_s16 }
  0x18   : > { %s268_s9 = scalar_lea.hbm %s1130_s3, %s587_s11  ;;  %s241_s26 = scalar_lea.sflag [#allocation3], %s240_s8 }
  0x19   : > { %622 = dma.hbm_to_vmem [thread:$0]  (!%p1010_p12), %s251_s17, 128, %s253_s16, %s241_s26  }
  0x1a   : > { %p59_p13 = scmp.eq.s32.totalorder %s967_s24, 0  ;;  %p582_p0 = scmp.ge.s32.totalorder %s901_s23, 1 }
  0x1b   : > { %p205_p1 = scmp.lt.s32.totalorder %s901_s23, 3  ;;  %s218_s14 = sshll.u32 %s1128_s1, 4  ;;  %s219_s14 = int_to_ptr.hbm [resolvable:$true] %s218_s14 }
  0x1c   : > { %p1027_p2 = por %p59_p13, %p58_p3  ;;  %s903_s8 = smov [#allocation5]  }
  0x1d   : > { %p1034_p4 = pnand %p582_p0, %p205_p1  ;;  %s220_s11 = sshll.u32 %s903_s8, 4  ;;  %s221_s11 = int_to_ptr.vmem [resolvable:$true] %s220_s11 }
  0x1e   : > { %s270_s16 = sshll.u32 %s268_s9, 4  ;;  %s263_s17 = scalar_lea.vmem [#allocation7], %s586_s10  ;;  %s271_s16 = int_to_ptr.hbm [resolvable:$true] %s270_s16 }
  0x1f   : > { %p615_p5 = pneg %p1034_p4  ;;  %s272_s27 = sshll.u32 %s263_s17, 4  ;;  %s273_s27 = int_to_ptr.vmem [resolvable:$true] %s272_s27 }
  0x20   : > { %s904_s29 = smov 128   ;;  %s905_s12 = smov 8  }
  0x21   : > { %p616_p3 = pnand %p615_p5, %p59_p13  ;;  %281 = sbr.rel (%p1034_p4) target bundleno = 195 (0xc3), region = 36 }
  0x22   : > { %625 = dma.hbm_to_vmem [thread:$0]  (!%p1010_p12), %s271_s16, 128, %s273_s27, %s241_s26  }
  0x23   : > { %618 = dma.hbm_to_vmem [thread:$0]  (!%p616_p3), %s219_s14, 512, %s221_s11, [#allocation6], %s904_s29, %s904_s29, %s905_s12  }
  0x24   : > { %s283_s13 = sand.u32 (!%p1034_p4), 1, %s967_s24   ;;  %s1048_s8 = sand.u32 (!%p1034_p4), 1, %s885_s19  }
  0x25   : > { %s1051_s9 = sshll.u32 (!%p1034_p4), %s1048_s8, 3  ;;  %s284_s10 = scalar_lea.sflag (!%p1034_p4), [#allocation3], %s283_s13 }
  0x26   : > { %s287_s17 = scalar_lea.vmem [#allocation2], %s1051_s9 }
  0x27   : > { %860 = dma.done.wait (%p1027_p2), %s284_s10, 128  }
  0x28   : > { %862 = vsyncadd (%p1027_p2), %s284_s10, 4294967168 }
  0x29   : > { %864 = dma.done.wait (%p59_p13), [#allocation6], 512  }
  0x2a   : > { %866 = vsyncadd (%p59_p13), [#allocation6], 4294966784  ;;  %s302_s26 = scalar_lea.vmem [#allocation7], %s1051_s9 }
  0x2b   : > { %868 = dma.done.wait (%p1027_p2), %s284_s10, 128  }
  0x2c   : > { %870 = vsyncadd (%p1027_p2), %s284_s10, 4294967168  ;;  %v350_v0 = vld [vmem:[#allocation5 + $0x18] sm:$0xff]  ;;  %v349_v1 = vld [vmem:[#allocation5 + $0x10] sm:$0xff]  ;;  %vm355_vm0 = vcmask 261120   ;;  %s599_s24 = sshll.u32 %s893_s21, 3  ;;  %s335_s16 = scalar_lea.vmem [#allocation8], %s1051_s9 }
  0x2d   : > { %371 = vmatpush.msra.mxu0 %v350_v0  ;;  %v348_v2 = vld [vmem:[#allocation5 + $0x8] sm:$0xff]  ;;  %v347_v3 = vld [vmem:[#allocation5] sm:$0xff]  ;;  %v346_v4 = vld [vmem:[%s287_s17] sm:$0xff]  ;;  %s402_s28 = scalar_lea.hbm %s1131_s4, %s599_s24  ;;  %s404_s27 = sshll.u32 %s335_s16, 4  ;;  %s405_s27 = int_to_ptr.vmem [resolvable:$true] %s404_s27 }
  0x2e   : > { %v688_v5 = vld [vmem:[%s1129_s2] ss:$0 sm:$0xff]  ;;  %s406_s29 = sshll.u32 %s402_s28, 4  ;;  %s417_s10 = scalar_lea.hbm %s1132_s5, %s599_s24  ;;  %v380_v7 = vld [vmem:[%s302_s26] sm:$0xff]  ;;  %s407_s29 = int_to_ptr.hbm [resolvable:$true] %s406_s29 }
  0x2f   : > { %372 = vmatpush.msra.mxu0 %v349_v1  ;;  %s342_s21 = scalar_lea.vmem [#allocation9], %s1051_s9  ;;  %s421_s25 = sshll.u32 %s417_s10, 4  ;;  %s422_s25 = int_to_ptr.hbm [resolvable:$true] %s421_s25 }
  0x30   : > { %s1079_s17 = sshll.u32 %s342_s21, 4  ;;  %s386_s14 = scalar_lea.sflag [#allocation4], %s1048_s8  ;;  %s420_s17 = int_to_ptr.vmem [resolvable:$true] %s1079_s17 }
  0x31   : > { %373 = vmatpush.msra.mxu0 %v348_v2  ;;  %s793_s15 = sshra.s32 %s407_s29, 4  ;;  %s799_s26 = scalar_lea.hbm %s1131_s4, 16  ;;  %s794_s15 = int_to_ptr.hbm [resolvable:$true] %s793_s15 }
  0x32   : > { %s795_s28 = scalar_lea.hbm %s794_s15, 8  ;;  %p800_p12 = scmp.lt.s32.totalorder %s794_s15, %s1131_s4 }
  0x33   : > { %374 = vmatpush.msra.mxu0 %v347_v3  ;;  %p796_p6 = scmp.ne.s32.totalorder %s794_s15, %s795_s28  ;;  %p801_p13 = scmp.lt.s32.totalorder %s799_s26, %s795_s28 }
  0x34   : > { %596 = vmatmul.msk.f32.vlgmr.msra.gmra.mxu0 %vm355_vm0, %v346_v4 }
  0x35   : > { %p797_p7 = pnand %p796_p6, %p986_p8  ;;  %p802_p0 = por %p801_p13, %p800_p12 }
  0x37   : > { %p798_p11 = pneg %p797_p7 }
  0x39   : > { %p803_p1 = pnand %p802_p0, %p798_p11 }
  0xb1   : > { %v376_v6 = vpop.f32.mrf.mxu0 }
  0xb2   : > { %v377_v8 = vadd.f32 %v688_v5, %v376_v6 }
  0xb4   : > { %379 = vst [vmem:[%s335_s16] sm:$0xff] %v377_v8  ;;  %v381_v9 = vsub.f32 %v377_v8, %v380_v7 }
  0xb5   : > { %806 = shalt.err (!%p803_p1)
}
  0xb6   : > { %611 = dma.vmem_to_hbm [thread:$0]  (%p986_p8), %s405_s27, 128, %s407_s29, %s386_s14   ;;  %v382_v10 = vmul.f32 %v381_v9, %v381_v9 }
  0xb7   : > { %s391_s9 = scalar_lea.sflag [#allocation10], %s1048_s8  ;;  %s821_s16 = sshra.s32 %s422_s25, 4  ;;  %s822_s16 = int_to_ptr.hbm [resolvable:$true] %s821_s16 }
  0xb8   : > { %384 = vst [vmem:[%s342_s21] sm:$0xff] %v382_v10  ;;  %s823_s10 = scalar_lea.hbm %s822_s16, 8  ;;  %s827_s24 = scalar_lea.hbm %s1132_s5, 16 }
  0xb9   : > { %p824_p2 = scmp.ne.s32.totalorder %s822_s16, %s823_s10  ;;  %p828_p3 = scmp.lt.s32.totalorder %s822_s16, %s1132_s5 }
  0xba   : > { %p829_p6 = scmp.lt.s32.totalorder %s827_s24, %s823_s10 }
  0xbb   : > { %p825_p4 = pnand %p824_p2, %p986_p8 }
  0xbc   : > { %p830_p7 = por %p829_p6, %p828_p3 }
  0xbd   : > { %p826_p5 = pneg %p825_p4 }
  0xbf   : > { %p831_p11 = pnand %p830_p7, %p826_p5 }
  0xc1   : > { %834 = shalt.err (!%p831_p11)
}
  0xc2   : > { %612 = dma.vmem_to_hbm [thread:$0]  (%p986_p8), %s420_s17, 128, %s422_s25, %s391_s9  }
  0xc3 PF: > { %s433_s8 = sand.u32 1, %s881_s18   ;;  %p627_p12 = pnand %p585_p10, %p993_p9 }
  0xc4   : > { %s434_s27 = scalar_lea.sflag [#allocation4], %s433_s8 }
  0xc5   : > { %p628_p13 = pneg %p627_p12 }
  0xc7   : > { %872 = dma.done.wait (%p628_p13), %s434_s27, 128  }
  0xc8   : > { %874 = vsyncadd (%p628_p13), %s434_s27, 4294967168  ;;  %s444_s29 = scalar_lea.sflag [#allocation10], %s433_s8 }
  0xc9   : > { %876 = dma.done.wait (%p628_p13), %s444_s29, 128  }
  0xca   : > { %878 = vsyncadd (%p628_p13), %s444_s29, 4294967168  ;;  %s26_s23 = sadd.s32 1, %s901_s23   ;;  %s1141_s30 = sld [smem:[#allocation16_spill]] }
  0xcb   : > { %p23_p0 = scmp.ge.s32.totalorder %s26_s23, 4   ;;  %s1142_s18 = smov %s885_s19 }
  0xcc   : > { %s1143_s19 = smov %s889_s20  ;;  %s1144_s20 = smov %s998_s7 }
  0xcd   : > { %s1145_s21 = smov %s897_s22  ;;  %25 = sbr.rel (!%p23_p0) target bundleno = 9 (0x9), region = 117 }
  0xd0   : > { %s1146_s22 = smov %s1141_s30 }
  0xd2   :  { %450 = vsyncpa [#allocation3], 1 }
  0xd3   :  { %452 = vsyncpa [#allocation3 + $0x1], 1 }
  0xd4   :  { %453 = vsyncpa [#allocation6], 1 }
  0xd5   :  { %454 = vsyncpa [#allocation4], 1 }
  0xd6   :  { %456 = vsyncpa [#allocation4 + $0x1], 1 }
  0xd7   :  { %457 = vsyncpa [#allocation10], 1 }
  0xd8   :  { %459 = vsyncpa [#allocation10 + $0x1], 1 }

</bundles_post_ra>
